<compile_context>
chip_gen: v7x
topology: tpu7x:2x2x1
jax: 0.10.0
libtpu: 0.0.40
codegen_flags: <defaults>
</compile_context>

<pallas_src>
import functools

import jax
import jax.numpy as jnp
from jax.experimental import pallas as pl
from jax.experimental.pallas import tpu as pltpu

D_IN = 310
D_H1 = 256
D_H2 = 128
D_OUT = 64


def _round_up(x, m):
    return ((x + m - 1) // m) * m


def _leaky_relu(x, slope=0.01):
    # max(x, slope*x) == LeakyReLU for 0 < slope < 1.
    return jnp.maximum(x, slope * x)


def cfe_kernel(x_ref, w1_ref, b1_ref, w2_ref, b2_ref, w3_ref, b3_ref, o_ref):
    # Fused f32 -> bf16 cast of the activation tile (VPU work, hidden under DMA).
    x = x_ref[...].astype(jnp.bfloat16)
    # Layer 1: (bm, 310)bf16 @ (310, 256)bf16 -> f32 accum (Mosaic masks unaligned K).
    h = jnp.dot(x, w1_ref[...], preferred_element_type=jnp.float32)
    h = _leaky_relu(h + b1_ref[...])
    # Layer 2: (bm, 256) @ (256, 128)
    h = jnp.dot(h.astype(jnp.bfloat16), w2_ref[...],
                preferred_element_type=jnp.float32)
    h = _leaky_relu(h + b2_ref[...])
    # Layer 3: (bm, 128) @ (128, 64)
    h = jnp.dot(h.astype(jnp.bfloat16), w3_ref[...],
                preferred_element_type=jnp.float32)
    h = _leaky_relu(h + b3_ref[...])
    o_ref[...] = h.astype(o_ref.dtype)


def prepare_params(w1, b1, w2, b2, w3, b3):
    """One-time weight cast / bias reshape, kept OUT of the per-call hot path."""
    return (
        jnp.asarray(w1, jnp.bfloat16),
        jnp.asarray(b1, jnp.float32).reshape(1, D_H1),
        jnp.asarray(w2, jnp.bfloat16),
        jnp.asarray(b2, jnp.float32).reshape(1, D_H2),
        jnp.asarray(w3, jnp.bfloat16),
        jnp.asarray(b3, jnp.float32).reshape(1, D_OUT),
    )


@functools.partial(jax.jit, static_argnames=("block_m",))
def cfe_forward(x, w1_bf, b1r, w2_bf, b2r, w3_bf, b3r, *, block_m=2048):
    """x: (B, 310) f32; params from prepare_params(); returns (B, 64) f32."""
    assert block_m % 8 == 0
    B, d_in = x.shape
    assert d_in == D_IN

    # Cap the tile so the grid has >= 2 steps when possible (both v7x TCs busy),
    # while keeping a multiple of 8 rows; shrink further for small batches.
    half = _round_up(-(-B // 2), 8)          # round_up(ceil(B/2), 8)
    bm = min(block_m, half)
    B_pad = _round_up(B, bm)
    if B_pad != B:
        # Only the batch remainder is padded (rows compute garbage, sliced off below).
        x = jnp.pad(x, ((0, B_pad - B), (0, 0)))

    grid = (B_pad // bm,)
    out = pl.pallas_call(
        cfe_kernel,
        out_shape=jax.ShapeDtypeStruct((B_pad, D_OUT), jnp.float32),
        grid_spec=pltpu.PrefetchScalarGridSpec(
            num_scalar_prefetch=0,
            grid=grid,
            in_specs=[
                pl.BlockSpec((bm, D_IN), lambda i: (i, 0)),      # x tile, raw f32
                # Constant block index => weights/biases stay resident in VMEM.
                pl.BlockSpec((D_IN, D_H1), lambda i: (0, 0)),    # W1 (310, 256) bf16
                pl.BlockSpec((1, D_H1), lambda i: (0, 0)),       # b1 f32
                pl.BlockSpec((D_H1, D_H2), lambda i: (0, 0)),    # W2 (256, 128) bf16
                pl.BlockSpec((1, D_H2), lambda i: (0, 0)),       # b2 f32
                pl.BlockSpec((D_H2, D_OUT), lambda i: (0, 0)),   # W3 (128, 64) bf16
                pl.BlockSpec((1, D_OUT), lambda i: (0, 0)),      # b3 f32
            ],
            out_specs=pl.BlockSpec((bm, D_OUT), lambda i: (i, 0)),
        ),
        compiler_params=pltpu.CompilerParams(
            dimension_semantics=("parallel",),   # shards batch tiles across TCs on v7x
            vmem_limit_bytes=32 * 1024 * 1024,
        ),
    )(x, w1_bf, b1r, w2_bf, b2r, w3_bf, b3r)

    if B_pad != B:
        out = out[:B]
    return out


def init_params(key):
    """Deterministic init matching PyTorch Linear shapes (stored transposed as (in, out))."""
    dims = [(D_IN, D_H1), (D_H1, D_H2), (D_H2, D_OUT)]
    params = []
    for i, (fan_in, fan_out) in enumerate(dims):
        kw, kb = jax.random.split(jax.random.fold_in(key, i))
        bound = 1.0 / jnp.sqrt(fan_in)
        w = jax.random.uniform(kw, (fan_in, fan_out), jnp.float32, -bound, bound)
        b = jax.random.uniform(kb, (fan_out,), jnp.float32, -bound, bound)
        params += [w, b]
    return params


def cfe_reference(x, w1, b1, w2, b2, w3, b3):
    h = jax.nn.leaky_relu(x @ w1 + b1, negative_slope=0.01)
    h = jax.nn.leaky_relu(h @ w2 + b2, negative_slope=0.01)
    h = jax.nn.leaky_relu(h @ w3 + b3, negative_slope=0.01)
    return h


if __name__ == "__main__":
    key = jax.random.PRNGKey(0)
    kx, kp = jax.random.split(key)

    B = 16  # small batch for the check; wrapper shrinks the tile accordingly
    x = jax.random.normal(kx, (B, D_IN), dtype=jnp.float32)
    w1, b1, w2, b2, w3, b3 = init_params(kp)

    params = prepare_params(w1, b1, w2, b2, w3, b3)   # one-time cast/reshape
    out = cfe_forward(x, *params)
    out = jax.block_until_ready(out)

    ref = cfe_reference(x, w1, b1, w2, b2, w3, b3)
    assert out.shape == (B, D_OUT), out.shape
    # bf16 matmuls with f32 accumulation vs. pure-f32 reference: loosened tolerance.
    assert jnp.allclose(out, ref, atol=3e-2, rtol=3e-2), "mismatch vs reference"

    print("KERNEL_OK")
</pallas_src>

<mosaic_0001>
module attributes {stable_mosaic.version = 11 : i64} {
  func.func @cfe_kernel(%arg0: i32, %arg1: memref<8x310xf32, #tpu.memory_space<vmem>>, %arg2: memref<310x256xbf16, #tpu.memory_space<vmem>>, %arg3: memref<1x256xf32, #tpu.memory_space<vmem>>, %arg4: memref<256x128xbf16, #tpu.memory_space<vmem>>, %arg5: memref<1x128xf32, #tpu.memory_space<vmem>>, %arg6: memref<128x64xbf16, #tpu.memory_space<vmem>>, %arg7: memref<1x64xf32, #tpu.memory_space<vmem>>, %arg8: memref<8x64xf32, #tpu.memory_space<vmem>>) attributes {dimension_semantics = [#tpu.dimension_semantics<parallel>], iteration_bounds = array<i64: 2>, scalar_prefetch = 0 : i64, scratch_operands = 0 : i64, tpu.core_type = #tpu.core_type<tc>, window_params = [{transform_indices = @transform_0, window_bounds = array<i64: 8, 310>}, {pipeline_mode = #tpu.pipeline_mode<synchronous>, transform_indices = @transform_1, window_bounds = array<i64: 310, 256>}, {pipeline_mode = #tpu.pipeline_mode<synchronous>, transform_indices = @transform_2, window_bounds = array<i64: 1, 256>}, {pipeline_mode = #tpu.pipeline_mode<synchronous>, transform_indices = @transform_3, window_bounds = array<i64: 256, 128>}, {pipeline_mode = #tpu.pipeline_mode<synchronous>, transform_indices = @transform_4, window_bounds = array<i64: 1, 128>}, {pipeline_mode = #tpu.pipeline_mode<synchronous>, transform_indices = @transform_5, window_bounds = array<i64: 128, 64>}, {pipeline_mode = #tpu.pipeline_mode<synchronous>, transform_indices = @transform_6, window_bounds = array<i64: 1, 64>}, {transform_indices = @transform_7, window_bounds = array<i64: 8, 64>}]} {
    %c0 = arith.constant 0 : index
    %c0_0 = arith.constant 0 : index
    %0 = vector.load %arg1[%c0, %c0_0] : memref<8x310xf32, #tpu.memory_space<vmem>>, vector<8x310xf32>
    %1 = arith.truncf %0 : vector<8x310xf32> to vector<8x310xbf16>
    %c0_1 = arith.constant 0 : index
    %c0_2 = arith.constant 0 : index
    %2 = vector.load %arg2[%c0_1, %c0_2] : memref<310x256xbf16, #tpu.memory_space<vmem>>, vector<310x256xbf16>
    %cst = arith.constant dense<0.000000e+00> : vector<8x256xf32>
    %3 = tpu.matmul %1, %2, %cst {dimension_numbers = #tpu.dot_dimension_numbers<[1], [0], [0], [1], [0, 0, 1, 1], [], []>} : vector<8x310xbf16>, vector<310x256xbf16>, vector<8x256xf32> -> vector<8x256xf32>
    %c0_3 = arith.constant 0 : index
    %c0_4 = arith.constant 0 : index
    %4 = vector.load %arg3[%c0_3, %c0_4] : memref<1x256xf32, #tpu.memory_space<vmem>>, vector<1x256xf32>
    %5 = vector.broadcast %4 : vector<1x256xf32> to vector<8x256xf32>
    %6 = arith.addf %3, %5 : vector<8x256xf32>
    %cst_5 = arith.constant 0.00999999977 : f32
    %7 = vector.broadcast %cst_5 : f32 to vector<8x256xf32>
    %8 = arith.mulf %7, %6 : vector<8x256xf32>
    %9 = arith.maximumf %6, %8 : vector<8x256xf32>
    %10 = arith.truncf %9 : vector<8x256xf32> to vector<8x256xbf16>
    %c0_6 = arith.constant 0 : index
    %c0_7 = arith.constant 0 : index
    %11 = vector.load %arg4[%c0_6, %c0_7] : memref<256x128xbf16, #tpu.memory_space<vmem>>, vector<256x128xbf16>
    %cst_8 = arith.constant dense<0.000000e+00> : vector<8x128xf32>
    %12 = tpu.matmul %10, %11, %cst_8 {dimension_numbers = #tpu.dot_dimension_numbers<[1], [0], [0], [1], [0, 0, 1, 1], [], []>} : vector<8x256xbf16>, vector<256x128xbf16>, vector<8x128xf32> -> vector<8x128xf32>
    %c0_9 = arith.constant 0 : index
    %c0_10 = arith.constant 0 : index
    %13 = vector.load %arg5[%c0_9, %c0_10] : memref<1x128xf32, #tpu.memory_space<vmem>>, vector<1x128xf32>
    %14 = vector.broadcast %13 : vector<1x128xf32> to vector<8x128xf32>
    %15 = arith.addf %12, %14 : vector<8x128xf32>
    %cst_11 = arith.constant 0.00999999977 : f32
    %16 = vector.broadcast %cst_11 : f32 to vector<8x128xf32>
    %17 = arith.mulf %16, %15 : vector<8x128xf32>
    %18 = arith.maximumf %15, %17 : vector<8x128xf32>
    %19 = arith.truncf %18 : vector<8x128xf32> to vector<8x128xbf16>
    %c0_12 = arith.constant 0 : index
    %c0_13 = arith.constant 0 : index
    %20 = vector.load %arg6[%c0_12, %c0_13] : memref<128x64xbf16, #tpu.memory_space<vmem>>, vector<128x64xbf16>
    %cst_14 = arith.constant dense<0.000000e+00> : vector<8x64xf32>
    %21 = tpu.matmul %19, %20, %cst_14 {dimension_numbers = #tpu.dot_dimension_numbers<[1], [0], [0], [1], [0, 0, 1, 1], [], []>} : vector<8x128xbf16>, vector<128x64xbf16>, vector<8x64xf32> -> vector<8x64xf32>
    %c0_15 = arith.constant 0 : index
    %c0_16 = arith.constant 0 : index
    %22 = vector.load %arg7[%c0_15, %c0_16] : memref<1x64xf32, #tpu.memory_space<vmem>>, vector<1x64xf32>
    %23 = vector.broadcast %22 : vector<1x64xf32> to vector<8x64xf32>
    %24 = arith.addf %21, %23 : vector<8x64xf32>
    %cst_17 = arith.constant 0.00999999977 : f32
    %25 = vector.broadcast %cst_17 : f32 to vector<8x64xf32>
    %26 = arith.mulf %25, %24 : vector<8x64xf32>
    %27 = arith.maximumf %24, %26 : vector<8x64xf32>
    %c0_18 = arith.constant 0 : index
    %c0_19 = arith.constant 0 : index
    %28 = vector.load %arg8[%c0_18, %c0_19] : memref<8x64xf32, #tpu.memory_space<vmem>>, vector<8x64xf32>
    tpu.vector_store %arg8[%c0_18, %c0_19], %27 {strides = array<i32>} : memref<8x64xf32, #tpu.memory_space<vmem>>, vector<8x64xf32>,
    return
  }
  func.func @transform_0(%arg0: i32) -> (i32, i32) {
    %c0_i32 = arith.constant 0 : i32
    %c0_i32_0 = arith.constant 0 : i32
    return %arg0, %c0_i32 : i32, i32
  }
  func.func @transform_1(%arg0: i32) -> (i32, i32) {
    %c0_i32 = arith.constant 0 : i32
    %c0_i32_0 = arith.constant 0 : i32
    %c0_i32_1 = arith.constant 0 : i32
    return %c0_i32, %c0_i32_0 : i32, i32
  }
  func.func @transform_2(%arg0: i32) -> (i32, i32) {
    %c0_i32 = arith.constant 0 : i32
    %c0_i32_0 = arith.constant 0 : i32
    %c0_i32_1 = arith.constant 0 : i32
    return %c0_i32, %c0_i32_0 : i32, i32
  }
  func.func @transform_3(%arg0: i32) -> (i32, i32) {
    %c0_i32 = arith.constant 0 : i32
    %c0_i32_0 = arith.constant 0 : i32
    %c0_i32_1 = arith.constant 0 : i32
    return %c0_i32, %c0_i32_0 : i32, i32
  }
  func.func @transform_4(%arg0: i32) -> (i32, i32) {
    %c0_i32 = arith.constant 0 : i32
    %c0_i32_0 = arith.constant 0 : i32
    %c0_i32_1 = arith.constant 0 : i32
    return %c0_i32, %c0_i32_0 : i32, i32
  }
  func.func @transform_5(%arg0: i32) -> (i32, i32) {
    %c0_i32 = arith.constant 0 : i32
    %c0_i32_0 = arith.constant 0 : i32
    %c0_i32_1 = arith.constant 0 : i32
    return %c0_i32, %c0_i32_0 : i32, i32
  }
  func.func @transform_6(%arg0: i32) -> (i32, i32) {
    %c0_i32 = arith.constant 0 : i32
    %c0_i32_0 = arith.constant 0 : i32
    %c0_i32_1 = arith.constant 0 : i32
    return %c0_i32, %c0_i32_0 : i32, i32
  }
  func.func @transform_7(%arg0: i32) -> (i32, i32) {
    %c0_i32 = arith.constant 0 : i32
    %c0_i32_0 = arith.constant 0 : i32
    return %arg0, %c0_i32 : i32, i32
  }
}

</mosaic_0001>

<bundles_post_ra>
// kernel: cfe_forward.1
= control target key start
LH: loop header
LB: loop body
LE: loop exit
PB: predicated region body
PF: predicated region fallthrough
CT: control target
= control target key end

     0   :  { %12 = vsyncpa [#allocation3], 0  ;;  %s1725_s0 = inlined_call_operand.vmem [shape: f32[16,310], index: 0, kind: input, shape index: {}]   ;;  %s1726_s1 = inlined_call_operand.hbm [shape: bf16[310,256], index: 1, kind: input, shape index: {}]   ;;  %s1727_s2 = inlined_call_operand.vmem [shape: f32[1,256], index: 2, kind: input, shape index: {}]   ;;  %s1728_s3 = inlined_call_operand.hbm [shape: bf16[256,128], index: 3, kind: input, shape index: {}]   ;;  %s1729_s4 = inlined_call_operand.vmem [shape: f32[1,128], index: 4, kind: input, shape index: {}]   ;;  %s1730_s5 = inlined_call_operand.vmem [shape: bf16[128,64], index: 5, kind: input, shape index: {}]   ;;  %s1731_s6 = inlined_call_operand.vmem [shape: f32[1,64], index: 6, kind: input, shape index: {}]   ;;  %s1732_s7 = inlined_call_operand.hbm [shape: f32[16,64], index: 7, kind: output, shape index: {}]  }
   0x1   :  { %13 = vsyncpa [#allocation6], 0 }
   0x2   :  { %14 = vsyncpa [#allocation4], 0 }
   0x3   :  { %16 = vsyncpa [#allocation4 + $0x1], 0  ;;  %s1515_s24 = smov 0   ;;  %s1517_s25 = smov 0  }
   0x4   :  { %s1519_s26 = smov 0   ;;  %s1521_s27 = smov 0  }
   0x5 LB: > { %s1536_s28 = sadd.s32 4294967295, %s1463_s27   ;;  %s1047_s29 = sadd.s32 4294967294, %s1463_s27   ;;  %s1463_s27 = sphi %s1521_s27, %s1752_s27   ;;  %s1459_s26 = sphi %s1519_s26, %s1751_s26   ;;  %s1455_s25 = sphi %s1517_s25, %s1750_s25   ;;  %s1451_s24 = sphi %s1515_s24, %s1749_s24  }
   0x6   : > { %s1540_s30 = sadd.s32 1, %s1463_s27   ;;  %s181_s8 = sadd.s32 1, %s1459_s26 }
   0x7   : > { %s178_s9 = ssub.s32 %s1463_s27, %s1540_s30  ;;  %p191_p0 = scmp.ne.s32.totalorder %s1459_s26, %s1455_s25 }
   0x8   : > { %p179_p1 = scmp.eq.s32.totalorder %s178_s9, 0  ;;  %p192_p2 = scmp.eq.s32.totalorder %s1536_s28, 1 }
   0x9   : > { %p197_p3 = scmp.ne.s32.totalorder %s1455_s25, %s1451_s24  ;;  %p198_p4 = scmp.eq.s32.totalorder %s1047_s29, 1 }
   0xa   : > { %s1551_s10 = scalar_select %p179_p1, %s1459_s26, %s181_s8  }
   0xb   : > { %p1553_p5 = por %p192_p2, %p191_p0  ;;  %p1557_p6 = por %p198_p4, %p197_p3 }
   0xc   : > { %1736 = sst [smem:[#allocation11_spill]] %s1551_s10  ;;  %p1048_p7 = scmp.ge.s32.totalorder %s1463_s27, 1 }
   0xd   : > { %s1737_s11 = scalar_select %p1553_p5, 1, 0 }
   0xe   : > { %s1738_s12 = scalar_select %p1557_p6, 1, 0 }
   0xf   : > { %p205_p8 = scmp.lt.s32.totalorder %s1463_s27, 3  ;;  %p1733_p9 = scmp.eq.s32.totalorder %s1536_s28, 0 }
  0x10   : > { %s1465_s14 = smov [#allocation2]   ;;  %s1466_s17 = smov [#allocation5]  }
  0x11   : > { %p1564_p10 = pnand %p1048_p7, %p205_p8  ;;  %s217_s15 = sshll.u32 %s1465_s14, 4  ;;  %s218_s15 = int_to_ptr.vmem [resolvable:$true] %s217_s15 }
  0x12   : > { %s233_s18 = sshll.u32 %s1466_s17, 4  ;;  %s1337_s21 = scalar_lea.hbm %s1726_s1, 4992  ;;  %s1576_s18 = int_to_ptr.vmem [resolvable:$true] %s233_s18 }
  0x13   : > { %s1739_s13 = scalar_select %p1564_p10, 1, 0 }
  0x14   : > { %p1197_p11 = pneg %p1564_p10  ;;  %p1338_p13 = scmp.ne.s32.totalorder %s1726_s1, %s1337_s21 }
  0x15   : > { %p1344_p3 = scmp.lt.u32.totalorder %s1337_s21, %s1726_s1 }
  0x16   : > { %p1572_p12 = pnand %p1733_p9, %p1197_p11 }
  0x18   : > { %p1339_p0 = pneg %p1572_p12 }
  0x1a   : > { %p1340_p1 = pnand %p1339_p0, %p1338_p13 }
  0x1c   : > { %p1341_p2 = pneg %p1340_p1 }
  0x1e   : > { %p1346_p4 = pnand %p1344_p3, %p1341_p2 }
  0x20   : > { %1349 = shalt.err (!%p1346_p4)
}
  0x21   : > { %s1350_s9 = scalar_lea.vmem %s218_s15, 4992  ;;  %p1358_p9 = scmp.lt.s32.totalorder %s218_s15, %s218_s15 }
  0x22   : > { %p1351_p7 = scmp.ne.s32.totalorder %s218_s15, %s1350_s9  ;;  %p1359_p6 = scmp.lt.s32.totalorder %s1350_s9, %s1350_s9 }
  0x24   : > { %p1353_p8 = pnand %p1351_p7, %p1339_p0  ;;  %p1360_p5 = por %p1359_p6, %p1358_p9 }
  0x26   : > { %p1354_p11 = pneg %p1353_p8 }
  0x28   : > { %p1361_p10 = pnand %p1360_p5, %p1354_p11 }
  0x2a   : > { %1364 = shalt.err (!%p1361_p10)
}
  0x2b   : > { %s1467_s14 = smov 128   ;;  %s1468_s17 = smov 8  }
  0x2c   : > { %1200 = dma.hbm_to_vmem [thread:$0]  (!%p1572_p12), %s1726_s1, 4992, %s218_s15, [#allocation3], %s1467_s14, %s1467_s14, %s1468_s17  }
  0x2d   : > { %s1365_s23 = scalar_lea.hbm %s1728_s3, 2048 }
  0x2e   : > { %p1366_p13 = scmp.ne.s32.totalorder %s1728_s3, %s1365_s23  ;;  %p1372_p9 = scmp.lt.u32.totalorder %s1365_s23, %s1728_s3 }
  0x30   : > { %p1368_p5 = pnand %p1366_p13, %p1339_p0 }
  0x32   : > { %p1369_p6 = pneg %p1368_p5 }
  0x34   : > { %p1374_p10 = pnand %p1372_p9, %p1369_p6 }
  0x36   : > { %1377 = shalt.err (!%p1374_p10)
}
  0x37   : > { %s1378_s15 = scalar_lea.vmem %s1576_s18, 2048  ;;  %p1386_p4 = scmp.lt.s32.totalorder %s1576_s18, %s1576_s18 }
  0x38   : > { %p1379_p1 = scmp.ne.s32.totalorder %s1576_s18, %s1378_s15  ;;  %p1387_p7 = scmp.lt.s32.totalorder %s1378_s15, %s1378_s15 }
  0x3a   : > { %p1381_p2 = pnand %p1379_p1, %p1339_p0  ;;  %p1388_p8 = por %p1387_p7, %p1386_p4 }
  0x3c   : > { %p1382_p3 = pneg %p1381_p2 }
  0x3e   : > { %p1389_p11 = pnand %p1388_p8, %p1382_p3 }
  0x40   : > { %1392 = shalt.err (!%p1389_p11)
}
  0x41   : > { %s1469_s10 = smov 64   ;;  %s1470_s14 = smov 4  }
  0x42   : > { %1203 = dma.hbm_to_vmem [thread:$0]  (!%p1572_p12), %s1728_s3, 2048, %s1576_s18, [#allocation6], %s1469_s10, %s1469_s10, %s1470_s14  }
  0x43   : > { %p1741_p13 = scmp.ne.s32.totalorder %s1739_s13, 0 }
  0x44   : > { %p1742_p0 = scmp.eq.s32.totalorder (!%p1741_p13), %s1536_s28, 0 }
  0x45   : > { %266 = sbr.rel (%p1741_p13) target bundleno = 838 (0x346), region = 48 }
  0x4c   : > { %1438 = dma.done.wait (%p1742_p0), [#allocation3], 4992   ;;  %p1743_p5 = pmov %p1742_p0 }
  0x4d   : > { %p1744_p6 = pmov %p1742_p0 }
  0x4e   : > { %1440 = vsyncadd (%p1743_p5), [#allocation3], 4294962304 }
  0x4f   : > { %1442 = dma.done.wait (%p1744_p6), [#allocation6], 2048   ;;  %p1745_p9 = pmov %p1742_p0 }
  0x50   : > { %v1254_v0 = vld [vmem:[#allocation2 + $0x4] ss:$8 sps:$4 sm:$0xff]   ;;  %v1256_v1 = vld [vmem:[#allocation2] ss:$8 sps:$4 sm:$0xff]   ;;  %v1257_v2 = vld [vmem:[#allocation2 + $0x14] ss:$8 sps:$4 sm:$0xff]  }
  0x51   : > { %1444 = vsyncadd (%p1745_p9), [#allocation6], 4294965248  ;;  %571 = vmatprep.subr.bf16.mxu0 %v1254_v0  ;;  %v1259_v3 = vld [vmem:[#allocation2 + $0x10] ss:$8 sps:$4 sm:$0xff]   ;;  %v1260_v4 = vld [vmem:[#allocation2 + $0x24] ss:$8 sps:$4 sm:$0xff]  }
  0x52   : > { %572 = vmatpush1.bf16.msra.mxu0 %v1256_v1  ;;  %p302_p12 = scmp.lt.s32.totalorder %s1536_s28, 1  ;;  %v1262_v5 = vld [vmem:[#allocation2 + $0x20] ss:$8 sps:$4 sm:$0xff]   ;;  %v1263_v6 = vld [vmem:[#allocation2 + $0x34] ss:$8 sps:$4 sm:$0xff]   ;;  %v1471_v51 = vmov 0  }
  0x53   : > { %573 = vmatprep.subr.bf16.mxu0 %v1257_v2  ;;  %v1265_v7 = vld [vmem:[#allocation2 + $0x30] ss:$8 sps:$4 sm:$0xff]   ;;  %v1266_v8 = vld [vmem:[#allocation2 + $0x44] ss:$8 sps:$4 sm:$0xff]   ;;  %v1268_v9 = vld [vmem:[#allocation2 + $0x40] ss:$8 sps:$4 sm:$0xff]   ;;  %v355_v2 = vlaneseq }
  0x54   : > { %s303_s13 = scalar_select %p302_p12, %s1536_s28, 1  ;;  %v1269_v10 = vld [vmem:[#allocation2 + $0x54] ss:$8 sps:$4 sm:$0xff]   ;;  %v1271_v11 = vld [vmem:[#allocation2 + $0x50] ss:$8 sps:$4 sm:$0xff]   ;;  %v1315_v22 = vld [vmem:[#allocation5 + $0x48] sm:$0xff]  }
  0x55   : > { %v1272_v12 = vld [vmem:[#allocation2 + $0x64] ss:$8 sps:$4 sm:$0xff]   ;;  %v1274_v15 = vld [vmem:[#allocation2 + $0x60] ss:$8 sps:$4 sm:$0xff]   ;;  %v1275_v16 = vld [vmem:[#allocation2 + $0x74] ss:$8 sps:$4 sm:$0xff]  }
  0x56   : > { %574 = vmatpush1.bf16.msra.mxu0 %v1259_v3  ;;  %s1186_s16 = smul.u32 24, %s303_s13  ;;  %v1277_v17 = vld [vmem:[#allocation2 + $0x70] ss:$8 sps:$4 sm:$0xff]   ;;  %v1278_v18 = vld [vmem:[#allocation2 + $0x84] ss:$8 sps:$4 sm:$0xff]   ;;  %vm564_vm0 = vcmask 1042432  }
  0x57   : > { %575 = vmatprep.subr.bf16.mxu0 %v1260_v4  ;;  %v1313_v19 = vld [vmem:[#allocation5 + $0x40] sm:$0xff]   ;;  %v1280_v21 = vld [vmem:[#allocation2 + $0x80] ss:$8 sps:$4 sm:$0xff]   ;;  %v1319_v28 = vld [vmem:[#allocation5 + $0x58] sm:$0xff]   ;;  %vm560_vm1 = vcmask 441344   ;;  %v1472_v1 = vmov 0.0  }
  0x58   : > { %s1640_s21 = scalar_lea.vmem %s1725_s0, %s1186_s16  ;;  %v1314_v20 = vld [vmem:[#allocation5] sm:$0xff]   ;;  %1129 = vmatprep.subr.bf16.mxu1 %v1313_v19  ;;  %v1316_v23 = vld [vmem:[#allocation5 + $0x8] sm:$0xff]   ;;  %v1317_v24 = vld [vmem:[#allocation5 + $0x50] sm:$0xff]   ;;  %v356_v3 = vshrl.u32 %v355_v2, 7  ;;  %vm1473_vm2 = vmmov 0   ;;  %s299_s15 = sand.u32 1, %s1455_s25  }
  0x59   : > { %v309_v13 = vld [vmem:[%s1640_s21 + $0x8] sm:$0xff]  ;;  %1130 = vmatpush3.bf16.msra.mxu1 %v1314_v20  ;;  %v1281_v25 = vld [vmem:[#allocation2 + $0x94] ss:$8 sps:$4 sm:$0xff]   ;;  %v1283_v26 = vld [vmem:[#allocation2 + $0x90] ss:$8 sps:$4 sm:$0xff]   ;;  %s1055_s10 = sshll.u32 %s299_s15, 3 }
  0x5a   : > { %576 = vmatpush1.bf16.msra.mxu0 %v1262_v5  ;;  %v312_v14 = vpack.c.bf16 %v309_v13, %v309_v13  ;;  %1131 = vmatprep.subr.bf16.mxu1 %v1315_v22  ;;  %v1318_v27 = vld [vmem:[#allocation5 + $0x10] sm:$0xff]   ;;  %v1320_v31 = vld [vmem:[#allocation5 + $0x18] sm:$0xff]   ;;  %v1321_v32 = vld [vmem:[#allocation5 + $0x60] sm:$0xff]   ;;  %v357_v4 = vsub.s32 0, %v356_v3  ;;  %s1126_s19 = sshll.u32 %s1536_s28, 7  ;;  %s301_s13 = scalar_lea.vmem [#allocation7], %s1055_s10 }
  0x5b   : > { %577 = vmatprep.subr.bf16.mxu0 %v1263_v6  ;;  %v1284_v29 = vld [vmem:[#allocation2 + $0xa4] ss:$8 sps:$4 sm:$0xff]   ;;  %v1286_v30 = vld [vmem:[#allocation2 + $0xa0] ss:$8 sps:$4 sm:$0xff]   ;;  %v1287_v33 = vld [vmem:[#allocation2 + $0xb4] ss:$8 sps:$4 sm:$0xff]  }
  0x5c   : > { %603 = vmatprep.mubr.bf16.mxu0 %v312_v14  ;;  %v1322_v34 = vld [vmem:[#allocation5 + $0x20] sm:$0xff]   ;;  %v1323_v36 = vld [vmem:[#allocation5 + $0x68] sm:$0xff]   ;;  %v352_v53 = vld [vmem:[#allocation2 + $0x130] sm:$0x77]  ;;  %v361_v6 = vsub.s32 1, %v356_v3  ;;  %s966_s16 = sshll.u32 %s301_s13, 4  ;;  %s1685_s16 = int_to_ptr.vmem [resolvable:$true] %s966_s16 }
  0x5d   : > { %1132 = vmatpush3.bf16.msra.mxu1 %v1316_v23  ;;  %v1289_v35 = vld [vmem:[#allocation2 + $0xb0] ss:$8 sps:$4 sm:$0xff]   ;;  %v1290_v37 = vld [vmem:[#allocation2 + $0xc4] ss:$8 sps:$4 sm:$0xff]   ;;  %v1292_v38 = vld [vmem:[#allocation2 + $0xc0] ss:$8 sps:$4 sm:$0xff]   ;;  %v1096_v55 = vcombine.high %v352_v53, %v352_v53  ;;  %v1095_v56 = vcombine.low %v352_v53, %v352_v53 }
  0x5e   : > { %578 = vmatpush1.bf16.msra.mxu0 %v1265_v7  ;;  %1133 = vmatprep.subr.bf16.mxu1 %v1317_v24  ;;  %v1293_v39 = vld [vmem:[#allocation2 + $0xd4] ss:$8 sps:$4 sm:$0xff]   ;;  %v1295_v40 = vld [vmem:[#allocation2 + $0xd0] ss:$8 sps:$4 sm:$0xff]   ;;  %v1296_v41 = vld [vmem:[#allocation2 + $0xe4] ss:$8 sps:$4 sm:$0xff]  }
  0x5f   : > { %579 = vmatprep.subr.bf16.mxu0 %v1266_v8  ;;  %v1298_v42 = vld [vmem:[#allocation2 + $0xe0] ss:$8 sps:$4 sm:$0xff]   ;;  %v1299_v43 = vld [vmem:[#allocation2 + $0xf4] ss:$8 sps:$4 sm:$0xff]   ;;  %v1301_v44 = vld [vmem:[#allocation2 + $0xf0] ss:$8 sps:$4 sm:$0xff]  }
  0x60   : > { %v308_v45 = vld [vmem:[%s1640_s21] sm:$0xff]  ;;  %v1307_v49 = vld [vmem:[#allocation2 + $0x114] ss:$8 sps:$4 sm:$0xff]   ;;  %v1305_v50 = vld [vmem:[#allocation2 + $0x110] ss:$8 sps:$4 sm:$0xff]   ;;  %v566_v58 = vsel %vm564_vm0, %v1095_v56, 0 }
  0x61   : > { %1134 = vmatpush3.bf16.msra.mxu1 %v1318_v27  ;;  %v1304_v46 = vld [vmem:[#allocation2 + $0x104] ss:$8 sps:$4 sm:$0xff]   ;;  %v311_v47 = vpack.c.bf16 %v308_v45, %v308_v45  ;;  %v1302_v48 = vld [vmem:[#allocation2 + $0x100] ss:$8 sps:$4 sm:$0xff]   ;;  %v310_v57 = vld [vmem:[%s1640_s21 + $0x10] sm:$0xff]  ;;  %vm950_vm3 = vcmask 523264   ;;  %s1683_s21 = scalar_lea.hbm %s1732_s7, %s1126_s19 }
  0x62   : > { %580 = vmatpush1.bf16.msra.mxu0 %v1268_v9  ;;  %1135 = vmatprep.subr.bf16.mxu1 %v1319_v28  ;;  %v1310_v52 = vld [vmem:[#allocation2 + $0x124] ss:$8 sps:$4 sm:$0xff]   ;;  %v1308_v54 = vld [vmem:[#allocation2 + $0x120] ss:$8 sps:$4 sm:$0xff]   ;;  %v313_v59 = vpack.c.bf16 %v310_v57, %v310_v57  ;;  %v1327_v63 = vld [vmem:[#allocation5 + $0x78] sm:$0xff]   ;;  %s953_s22 = scalar_lea.sflag [#allocation4], %s299_s15 }
  0x63   : > { %581 = vmatprep.subr.bf16.mxu0 %v1269_v10  ;;  %v1324_v60 = vld [vmem:[#allocation5 + $0x28] sm:$0xff]   ;;  %v1325_v61 = vld [vmem:[#allocation5 + $0x70] sm:$0xff]   ;;  %v1328_v0 = vld [vmem:[#allocation5 + $0x38] sm:$0xff]   ;;  %s1393_s23 = scalar_lea.vmem %s1685_s16, 128  ;;  %p1746_p1 = scmp.ne.s32.totalorder %s1737_s11, 0 }
  0x64   : > { %v1326_v62 = vld [vmem:[#allocation5 + $0x30] sm:$0xff]   ;;  %v353_v5 = vld [vmem:[%s1727_s2] sm:$0x3]  ;;  %v1331_v23 = vld [vmem:[%s1730_s5 + $0x10] sm:$0xff]   ;;  %p1394_p10 = scmp.ne.s32.totalorder %s1685_s16, %s1393_s23  ;;  %s1474_s28 = smov [#allocation7]  }
  0x65   : > { %1136 = vmatpush3.bf16.msra.mxu1 %v1320_v31  ;;  %v358_v7 = vrot.slane %v353_v5, %v357_v4  ;;  %v362_v8 = vrot.slane %v353_v5, %v361_v6  ;;  %v1329_v20 = vld [vmem:[%s1730_s5] sm:$0xff]   ;;  %v1330_v22 = vld [vmem:[%s1730_s5 + $0x8] sm:$0xff]   ;;  %v1332_v24 = vld [vmem:[%s1730_s5 + $0x18] sm:$0xff]   ;;  %s1397_s29 = sshll.u32 %s1474_s28, 4  ;;  %s1398_s29 = int_to_ptr.vmem [resolvable:$false] %s1397_s29 }
  0x66   : > { %582 = vmatpush1.bf16.msra.mxu0 %v1271_v11  ;;  %1137 = vmatprep.subr.bf16.mxu1 %v1321_v32  ;;  %v1335_v27 = vld [vmem:[%s1730_s5 + $0x30] sm:$0xff]   ;;  %v1336_v28 = vld [vmem:[%s1730_s5 + $0x38] sm:$0xff]   ;;  %p1395_p2 = pnand %p1394_p10, %p1746_p1  ;;  %s1399_s8 = scalar_lea.vmem %s1398_s29, 256 }
  0x67   : > { %583 = vmatprep.subr.bf16.mxu0 %v1272_v12  ;;  %p1400_p4 = scmp.lt.s32.totalorder %s1685_s16, %s1398_s29  ;;  %p1401_p7 = scmp.lt.s32.totalorder %s1399_s8, %s1393_s23 }
  0x68   : > { %p1396_p3 = pneg %p1395_p2 }
  0x69   : > { %1138 = vmatpush3.bf16.msra.mxu1 %v1322_v34  ;;  %p1402_p8 = por %p1401_p7, %p1400_p4 }
  0x6a   : > { %584 = vmatpush1.bf16.msra.mxu0 %v1274_v15  ;;  %1139 = vmatprep.subr.bf16.mxu1 %v1323_v36 }
  0x6b   : > { %585 = vmatprep.subr.bf16.mxu0 %v1275_v16  ;;  %p1403_p11 = pnand %p1402_p8, %p1396_p3 }
  0x6d   : > { %1140 = vmatpush3.bf16.msra.mxu1 %v1324_v60 }
  0x6e   : > { %586 = vmatpush1.bf16.msra.mxu0 %v1277_v17  ;;  %1141 = vmatprep.subr.bf16.mxu1 %v1325_v61 }
  0x6f   : > { %587 = vmatprep.subr.bf16.mxu0 %v1278_v18 }
  0x71   : > { %1142 = vmatpush3.bf16.msra.mxu1 %v1326_v62 }
  0x72   : > { %588 = vmatpush1.bf16.msra.mxu0 %v1280_v21  ;;  %1143 = vmatprep.subr.bf16.mxu1 %v1327_v63 }
  0x73   : > { %589 = vmatprep.subr.bf16.mxu0 %v1281_v25  ;;  %v1333_v25 = vld [vmem:[%s1730_s5 + $0x20] sm:$0xff]  }
  0x75   : > { %1144 = vmatpush3.bf16.msra.mxu1 %v1328_v0 }
  0x76   : > { %590 = vmatpush1.bf16.msra.mxu0 %v1283_v26  ;;  %1160 = vmatprep.subr.bf16.mxu1 %v1472_v1  ;;  %v1334_v26 = vld [vmem:[%s1730_s5 + $0x28] sm:$0xff]  }
  0x77   : > { %591 = vmatprep.subr.bf16.mxu0 %v1284_v29 }
  0x7a   : > { %592 = vmatpush1.bf16.msra.mxu0 %v1286_v30  ;;  %v1099_v30 = vld [vmem:[%s1729_s4] ss:$0 sm:$0xff] }
  0x7b   : > { %593 = vmatprep.subr.bf16.mxu0 %v1287_v33 }
  0x7e   : > { %594 = vmatpush1.bf16.msra.mxu0 %v1289_v35 }
  0x7f   : > { %595 = vmatprep.subr.bf16.mxu0 %v1290_v37 }
  0x82   : > { %596 = vmatpush1.bf16.msra.mxu0 %v1292_v38 }
  0x83   : > { %597 = vmatprep.subr.bf16.mxu0 %v1293_v39  ;;  %v1116_v39 = vld [vmem:[%s1731_s6] ss:$0 sm:$0xff] }
  0x86   : > { %598 = vmatpush1.bf16.msra.mxu0 %v1295_v40 }
  0x87   : > { %599 = vmatprep.subr.bf16.mxu0 %v1296_v41 }
  0x8a   : > { %600 = vmatpush1.bf16.msra.mxu0 %v1298_v42 }
  0x8b   : > { %601 = vmatprep.subr.bf16.mxu0 %v1299_v43 }
  0x8e   : > { %602 = vmatpush1.bf16.msra.mxu0 %v1301_v44 }
  0x8f   : > { %612 = vmatprep.subr.bf16.mxu0 %v1304_v46 }
  0x91   : > { %604 = vmatmul.mubr.bf16.vlgmr.msra.gmra.mrb[0].mxu0 %v311_v47 }
  0x92   : > { %613 = vmatpush1.bf16.msra.mxu0 %v1302_v48  ;;  %644 = vmatprep.mubr.bf16.mxu0 %v1471_v51 }
  0x93   : > { %614 = vmatprep.subr.bf16.mxu0 %v1307_v49 }
  0x96   : > { %615 = vmatpush1.bf16.msra.mxu0 %v1305_v50 }
  0x97   : > { %616 = vmatprep.subr.bf16.mxu0 %v1310_v52 }
  0x9a   : > { %617 = vmatpush1.bf16.msra.mxu0 %v1308_v54 }
  0x9b   : > { %1097 = vmatprep.subr.msk.bf16.mxu0 %vm564_vm0, %v1096_v55 }
  0x9e   : > { %619 = vmatpush1.bf16.msra.mxu0 %v566_v58 }
  0xa1   : > { %1098 = vmatmul.mubr.msk.bf16.vlgmr.msra.gmra.mrb[0].mxu0 %vm560_vm1, %v313_v59 }
 0x174   : > { %v646_v9 = vpop.f32.mrb[0].mxu0 }
 0x175   : > { %v1180_v10 = vadd.f32 %v646_v9, %v358_v7  ;;  %v648_v11 = vpop.f32.mrb[1].mxu0 }
 0x176   : > { %v1181_v12 = vadd.f32 %v648_v11, %v362_v8  ;;  %v650_v13 = vpop.f32.mrb[2].mxu0 }
 0x177   : > { %v653_v14 = vmul.f32 0.01, %v1180_v10  ;;  %v651_v15 = vpop.f32.mrb[3].mxu0 }
 0x178   : > { %v654_v16 = vmul.f32 0.01, %v1181_v12 }
 0x179   : > { %v655_v17 = vmax.f32 %v1180_v10, %v653_v14 }
 0x17a   : > { %v656_v18 = vmax.f32 %v1181_v12, %v654_v16 }
 0x17b   : > { %v657_v21 = vpack.c.bf16 %v655_v17, %v655_v17 }
 0x17c   : > { %v658_v19 = vpack.c.bf16 %v656_v18, %v656_v18 }
 0x17e   : > { %826 = vmatprep.mubr.bf16.mxu1 %v658_v19 }
 0x17f   : > { %827 = vmatmul.mubr.bf16.vlgmr.msra.gmra.mrb[0].mxu1 %v657_v21 }
 0x180   : > { %1161 = vmatpush3.bf16.msra.mxu1 %v1329_v20  ;;  %1176 = vmatprep.mubr.msk.bf16.mxu1 %vm1473_vm2, %v1472_v1 }
 0x181   : > { %1162 = vmatprep.subr.bf16.mxu1 %v1472_v1 }
 0x184   : > { %1163 = vmatpush3.bf16.msra.mxu1 %v1330_v22 }
 0x185   : > { %1164 = vmatprep.subr.bf16.mxu1 %v1472_v1 }
 0x188   : > { %1165 = vmatpush3.bf16.msra.mxu1 %v1331_v23 }
 0x189   : > { %1166 = vmatprep.subr.bf16.mxu1 %v1472_v1 }
 0x18c   : > { %1167 = vmatpush3.bf16.msra.mxu1 %v1332_v24 }
 0x18d   : > { %1168 = vmatprep.subr.bf16.mxu1 %v1472_v1 }
 0x190   : > { %1169 = vmatpush3.bf16.msra.mxu1 %v1333_v25 }
 0x191   : > { %1170 = vmatprep.subr.bf16.mxu1 %v1472_v1 }
 0x194   : > { %1171 = vmatpush3.bf16.msra.mxu1 %v1334_v26 }
 0x195   : > { %1172 = vmatprep.subr.bf16.mxu1 %v1472_v1 }
 0x198   : > { %1173 = vmatpush3.bf16.msra.mxu1 %v1335_v27 }
 0x199   : > { %1174 = vmatprep.subr.bf16.mxu1 %v1472_v1 }
 0x19c   : > { %1175 = vmatpush3.bf16.msra.mxu1 %v1336_v28 }
 0x252   : > { %v1145_v29 = vpop.f32.mrb[0].mxu1 }
 0x253   : > { %v1146_v31 = vpop.f32.mrb[1].mxu1 }
 0x254   : > { %v1147_v32 = vadd.f32 %v1146_v31, %v1145_v29  ;;  %v1148_v33 = vpop.f32.mrb[2].mxu1 }
 0x255   : > { %v1149_v34 = vpop.f32.mrb[3].mxu1 }
 0x256   : > { %v829_v35 = vadd.f32 %v1147_v32, %v1099_v30 }
 0x258   : > { %v834_v36 = vmul.f32 0.01, %v829_v35 }
 0x25a   : > { %v835_v37 = vmax.f32 %v829_v35, %v834_v36 }
 0x25c   : > { %v836_v38 = vpack.c.bf16 %v835_v37, %v835_v37 }
 0x25e   : > { %1177 = vmatmul.mubr.bf16.vlgmr.msra.gmra.mrb[4].mxu1 %v836_v38 }
 0x331   : > { %v942_v40 = vpop.f32.mrb[4].mxu1 }
 0x332   : > { %v943_v41 = vadd.f32 %v1116_v39, %v942_v40  ;;  %v1178_v42 = vpop.f32.mrb[5].mxu1 }
 0x333   : > { %v945_v43 = vpop.f32.mrb[6].mxu1 }
 0x334   : > { %v948_v44 = vmul.f32 0.01, %v943_v41  ;;  %v1179_v45 = vpop.f32.mrb[7].mxu1 }
 0x336   : > { %v949_v46 = vmax.f32 %v943_v41, %v948_v44 }
 0x338   : > { %951 = vst.msk [vmem:[%s301_s13] sm:$0xff] %vm950_vm3, %v949_v46 }
 0x339   : > { %1406 = shalt.err (!%p1403_p11)
}
 0x33a   : > { %s1407_s9 = scalar_lea.hbm %s1683_s21, 128  ;;  %s1411_s14 = scalar_lea.hbm %s1732_s7, 256 }
 0x33b   : > { %p1408_p13 = scmp.ne.s32.totalorder %s1683_s21, %s1407_s9  ;;  %p1412_p6 = scmp.lt.u32.totalorder %s1683_s21, %s1732_s7 }
 0x33c   : > { %p1413_p9 = scmp.lt.u32.totalorder %s1411_s14, %s1407_s9  ;;  %p1415_p10 = scmp.lt.u32.totalorder %s1407_s9, %s1683_s21 }
 0x33d   : > { %p1409_p0 = pnand %p1408_p13, %p1746_p1 }
 0x33e   : > { %p1414_p12 = por %p1413_p9, %p1412_p6 }
 0x33f   : > { %p1410_p5 = pneg %p1409_p0 }
 0x340   : > { %p1416_p2 = por %p1415_p10, %p1414_p12 }
 0x342   : > { %p1417_p3 = pnand %p1416_p2, %p1410_p5 }
 0x344   : > { %1420 = shalt.err (!%p1417_p3)
}
 0x345   : > { %1195 = dma.vmem_to_hbm [thread:$0]  (%p1746_p1), %s1685_s16, 128, %s1683_s21, %s953_s22  }
 0x346 PF: > { %p1212_p4 = scmp.ge.s32.totalorder %s1463_s27, 2  ;;  %s978_s13 = sand.u32 1, %s1451_s24  }
 0x347   : > { %p1747_p7 = scmp.ne.s32.totalorder %s1738_s12, 0  ;;  %s979_s18 = scalar_lea.sflag [#allocation4], %s978_s13 }
 0x349   : > { %p1205_p8 = pnand %p1212_p4, %p1747_p7 }
 0x34b   : > { %1446 = dma.done.wait (!%p1205_p8), %s979_s18, 128  }
 0x34c   : > { %1448 = vsyncadd (!%p1205_p8), %s979_s18, 4294967168  ;;  %s1748_s20 = sld [smem:[#allocation11_spill]]  ;;  %p19_p11 = scmp.ge.s32.totalorder %s1540_s30, 4  }
 0x34d   : > { %s1749_s24 = smov %s1455_s25  ;;  %s1750_s25 = smov %s1459_s26 }
 0x34e   : > { %s1752_s27 = smov %s1540_s30  ;;  %21 = sbr.rel (!%p19_p11) target bundleno = 5 (0x5), region = 92 }
 0x352   : > { %s1751_s26 = smov %s1748_s20 }
 0x355   :  { %984 = vsyncpa [#allocation3], 1 }
 0x356   :  { %986 = vsyncpa [#allocation3 + $0x1], 1 }
 0x357   :  { %987 = vsyncpa [#allocation6], 1 }
 0x358   :  { %988 = vsyncpa [#allocation4], 1 }
 0x359   :  { %990 = vsyncpa [#allocation4 + $0x1], 1 }

</bundles_post_ra>
